<compile_context>
chip_gen: v7x
topology: tpu7x:2x2x1
jax: 0.10.0
libtpu: 0.0.40
codegen_flags: <defaults>
</compile_context>

<pallas_src>
import functools

import jax
import jax.numpy as jnp
from jax.experimental import pallas as pl
from jax.experimental.pallas import tpu as pltpu


def _round_up(x, m):
    return ((x + m - 1) // m) * m


def _num_tensorcores_per_chip():
    """2 on v7x (megacore), 1 on v5e/v6e. Safe fallback to 1."""
    try:
        kind = jax.devices()[0].device_kind.lower()
    except Exception:
        return 1
    return 2 if ("v7" in kind or "7x" in kind) else 1


def _graph_embed_kernel(
    x_ref,            # (TN, node_dim) node block, f32 (straight from HBM)
    w1_ref, b1_ref,   # (node_dim, Dh) bf16, (1, Dh) f32   fused [W1 | wg], [b1 | bg]
    w2_ref, b2_ref,   # (Dh, Dh) bf16,        (1, Dh) f32
    w3_ref, b3_ref,   # (Dh, Dh) bf16,        (1, Dh) f32  b3 carries a 1.0 "ones" col
    w4_ref,           # (Dh, G) bf16          b4 folded into row `gate_col`
    out_ref,          # (8, G) f32            per-part partial (all 8 rows used)
    acc_ref,          # (8, Dh) f32           VMEM accumulator scratch
    *, n_nodes, block_n, blocks_per_part, gate_col,
):
    part = pl.program_id(0)
    step = pl.program_id(1)

    @pl.when(step == 0)
    def _init():
        acc_ref[...] = jnp.zeros_like(acc_ref)

    f32, bf16 = jnp.float32, jnp.bfloat16

    # Global row index of every row in this block.  Rows >= n_nodes are the
    # ragged-tail padding of the last block (unspecified data) — zero them
    # before they can poison the matmuls, and zero their gate so they never
    # contribute to the reduction.
    base = (part * blocks_per_part + step) * block_n
    row = base + jax.lax.broadcasted_iota(jnp.int32, (block_n, 1), 0)
    valid = row < n_nodes

    x = jnp.where(valid, x_ref[...], 0.0).astype(bf16)

    # Fused layer 1: one bf16 MXU matmul yields h1 (real columns) and the
    # gate logit (stashed in padded column `gate_col`).
    z = jnp.dot(x, w1_ref[...], preferred_element_type=f32) + b1_ref[...]
    gate = jnp.where(valid, jax.nn.sigmoid(z[:, gate_col:gate_col + 1]), 0.0)

    h = jnp.maximum(z, 0.0).astype(bf16)
    h = jnp.maximum(jnp.dot(h, w2_ref[...], preferred_element_type=f32)
                    + b2_ref[...], 0.0).astype(bf16)
    h = jnp.maximum(jnp.dot(h, w3_ref[...], preferred_element_type=f32)
                    + b3_ref[...], 0.0).astype(bf16)      # col gate_col == 1.0

    # Gated node reduction on the MXU without materializing gate*h and
    # without a single-sublane read-modify-write: scatter gate of row i into
    # lane (i % 8) of a thin (TN, 8) matrix and contract the node axis
    # against h  ->  g8^T @ h  ->  (8, Dh) partial spread over all acc rows.
    lane = jax.lax.broadcasted_iota(jnp.int32, (block_n, 8), 1)
    g8 = jnp.where((row % 8) == lane, gate, 0.0).astype(bf16)     # (TN, 8)
    acc_ref[...] += jax.lax.dot_general(
        g8, h, (((0,), (0,)), ((), ())), preferred_element_type=f32)

    @pl.when(step == pl.num_programs(1) - 1)
    def _finalize():
        # out = acc @ W4 ; the b4-row of W4 pairs with the "ones" column of
        # acc (sum of gate), so summing the 8 rows outside yields
        # sum_n gate_n * (h_n @ W4 + b4).
        out_ref[...] = jnp.dot(acc_ref[...].astype(bf16), w4_ref[...],
                               preferred_element_type=f32)


@functools.partial(jax.jit, static_argnames=("block_n",))
def graph_embed(nodes, params, *, block_n=1024):
    """nodes: (N, node_dim) float32. Returns (1, graph_dim) float32."""
    n, node_dim = nodes.shape
    graph_dim = params["w4"].shape[1]
    if n == 0:
        # Mirrors the PyTorch early-exit for an empty graph.
        return jnp.zeros((1, graph_dim), jnp.float32)

    f32, bf16 = jnp.float32, jnp.bfloat16
    dh = _round_up(node_dim + 1, 128)    # lane-padded hidden dim (+ gate/ones col)
    gd = _round_up(graph_dim, 128)       # lane-padded graph dim
    gate_col = node_dim                  # gate-logit / ones / b4-row index

    # ---- pack & lane-pad parameters (tiny, one-time, bf16 MXU operands) ----
    w1f = (jnp.zeros((node_dim, dh), f32)
           .at[:, :node_dim].set(params["w1"].astype(f32))
           .at[:, gate_col].set(params["wg"][:, 0].astype(f32))).astype(bf16)
    b1f = (jnp.zeros((1, dh), f32)
           .at[0, :node_dim].set(params["b1"][0].astype(f32))
           .at[0, gate_col].set(params["bg"][0, 0].astype(f32)))
    w2p = (jnp.zeros((dh, dh), f32)
           .at[:node_dim, :node_dim].set(params["w2"].astype(f32))).astype(bf16)
    b2p = jnp.zeros((1, dh), f32).at[0, :node_dim].set(params["b2"][0].astype(f32))
    w3p = (jnp.zeros((dh, dh), f32)
           .at[:node_dim, :node_dim].set(params["w3"].astype(f32))).astype(bf16)
    b3p = (jnp.zeros((1, dh), f32)
           .at[0, :node_dim].set(params["b3"][0].astype(f32))
           .at[0, gate_col].set(1.0))          # ones column -> accumulates sum(gate)
    w4p = (jnp.zeros((dh, gd), f32)
           .at[:node_dim, :graph_dim].set(params["w4"].astype(f32))
           .at[gate_col, :graph_dim].set(params["b4"][0].astype(f32))).astype(bf16)

    # ---- node-block / grid sizing (sublane aligned, megacore-aware) --------
    blk = max(8, min(_round_up(block_n, 8), _round_up(n, 8)))
    total_blocks = -(-n // blk)
    num_tc = _num_tensorcores_per_chip()
    parts = num_tc if (num_tc > 1 and total_blocks % num_tc == 0) else 1
    blocks_per_part = total_blocks // parts

    kernel = functools.partial(
        _graph_embed_kernel, n_nodes=n, block_n=blk,
        blocks_per_part=blocks_per_part, gate_col=gate_col)

    const = lambda r, c: pl.BlockSpec((r, c), lambda p, b: (0, 0))

    partials = pl.pallas_call(
        kernel,
        out_shape=jax.ShapeDtypeStruct((parts * 8, gd), f32),
        grid_spec=pltpu.PrefetchScalarGridSpec(
            num_scalar_prefetch=0,
            grid=(parts, blocks_per_part),
            in_specs=[
                pl.BlockSpec((blk, node_dim),
                             lambda p, b: (p * blocks_per_part + b, 0)),
                const(node_dim, dh), const(1, dh),   # fused W1|wg, b1|bg
                const(dh, dh), const(1, dh),         # W2, b2
                const(dh, dh), const(1, dh),         # W3, b3 (+ ones column)
                const(dh, gd),                       # W4 (+ b4 row)
            ],
            out_specs=pl.BlockSpec((8, gd), lambda p, b: (p, 0)),
            scratch_shapes=[pltpu.VMEM((8, dh), jnp.float32)],
        ),
        compiler_params=pltpu.CompilerParams(
            dimension_semantics=("parallel", "arbitrary"),
        ),
    )(nodes.astype(f32), w1f, b1f, w2p, b2p, w3p, b3p, w4p)

    # Every row of every per-part partial holds a valid share of the result;
    # one sum reduces rows and parts, then drop the lane padding.
    return jnp.sum(partials, axis=0, keepdims=True)[:, :graph_dim]


def init_params(key, node_dim, graph_dim):
    """Deterministic synthetic parameters (PyTorch-Linear-like uniform init)."""
    def linear(k, fan_in, fan_out):
        kw, kb = jax.random.split(k)
        bound = 1.0 / jnp.sqrt(fan_in)
        w = jax.random.uniform(kw, (fan_in, fan_out), jnp.float32, -bound, bound)
        b = jax.random.uniform(kb, (1, fan_out), jnp.float32, -bound, bound)
        return w, b

    ks = jax.random.split(key, 5)
    wg, bg = linear(ks[0], node_dim, 1)
    w1, b1 = linear(ks[1], node_dim, node_dim)
    w2, b2 = linear(ks[2], node_dim, node_dim)
    w3, b3 = linear(ks[3], node_dim, node_dim)
    w4, b4 = linear(ks[4], node_dim, graph_dim)
    return dict(wg=wg, bg=bg, w1=w1, b1=b1, w2=w2, b2=b2, w3=w3, b3=b3,
                w4=w4, b4=b4)


def graph_embed_ref(nodes, p):
    """Pure-JAX f32 reference of the PyTorch forward."""
    gate = jax.nn.sigmoid(nodes @ p["wg"] + p["bg"])
    h = jax.nn.relu(nodes @ p["w1"] + p["b1"])
    h = jax.nn.relu(h @ p["w2"] + p["b2"])
    h = jax.nn.relu(h @ p["w3"] + p["b3"])
    y = h @ p["w4"] + p["b4"]
    return jnp.sum(gate * y, axis=0, keepdims=True)


if __name__ == "__main__":
    node_dim, graph_dim = 32, 64

    key = jax.random.PRNGKey(0)
    k_params, k_a, k_b = jax.random.split(key, 3)
    params = init_params(k_params, node_dim, graph_dim)

    def check(nodes, **kw):
        out = jax.block_until_ready(graph_embed(nodes, params, **kw))
        ref = graph_embed_ref(nodes, params)
        assert out.shape == (1, graph_dim)
        err = float(jnp.max(jnp.abs(out - ref)))
        scale = float(jnp.max(jnp.abs(ref))) + 1e-3
        # bf16 MXU operands (f32 accumulation) -> ~1e-2-relative tolerance.
        assert err <= 5e-2 * scale + 2e-2, f"mismatch: max abs err {err} (scale {scale})"

    # Small graph (16 nodes): single 16-row block.
    nodes_a = jax.random.normal(k_a, (16, node_dim), jnp.float32)
    check(nodes_a)

    # Ragged graph (300 nodes), default block: one 304-row block w/ masked tail.
    nodes_b = jax.random.normal(k_b, (300, node_dim), jnp.float32)
    check(nodes_b)

    # Same graph, small blocks: exercises multi-block accumulation + masking.
    check(nodes_b, block_n=128)

    print("KERNEL_OK")
</pallas_src>

<mosaic_0001>
module attributes {stable_mosaic.version = 11 : i64} {
  func.func @_graph_embed_kernel(%arg0: i32, %arg1: i32, %arg2: memref<16x32xf32, #tpu.memory_space<vmem>>, %arg3: memref<32x128xbf16, #tpu.memory_space<vmem>>, %arg4: memref<1x128xf32, #tpu.memory_space<vmem>>, %arg5: memref<128x128xbf16, #tpu.memory_space<vmem>>, %arg6: memref<1x128xf32, #tpu.memory_space<vmem>>, %arg7: memref<128x128xbf16, #tpu.memory_space<vmem>>, %arg8: memref<1x128xf32, #tpu.memory_space<vmem>>, %arg9: memref<128x128xbf16, #tpu.memory_space<vmem>>, %arg10: memref<8x128xf32, #tpu.memory_space<vmem>>, %arg11: memref<8x128xf32, #tpu.memory_space<vmem>>) attributes {dimension_semantics = [#tpu.dimension_semantics<parallel>, #tpu.dimension_semantics<arbitrary>], iteration_bounds = array<i64: 1, 1>, scalar_prefetch = 0 : i64, scratch_operands = 1 : i64, tpu.core_type = #tpu.core_type<tc>, window_params = [{transform_indices = @transform_0, window_bounds = array<i64: 16, 32>}, {pipeline_mode = #tpu.pipeline_mode<synchronous>, transform_indices = @transform_1, window_bounds = array<i64: 32, 128>}, {pipeline_mode = #tpu.pipeline_mode<synchronous>, transform_indices = @transform_2, window_bounds = array<i64: 1, 128>}, {pipeline_mode = #tpu.pipeline_mode<synchronous>, transform_indices = @transform_3, window_bounds = array<i64: 128, 128>}, {pipeline_mode = #tpu.pipeline_mode<synchronous>, transform_indices = @transform_4, window_bounds = array<i64: 1, 128>}, {pipeline_mode = #tpu.pipeline_mode<synchronous>, transform_indices = @transform_5, window_bounds = array<i64: 128, 128>}, {pipeline_mode = #tpu.pipeline_mode<synchronous>, transform_indices = @transform_6, window_bounds = array<i64: 1, 128>}, {pipeline_mode = #tpu.pipeline_mode<synchronous>, transform_indices = @transform_7, window_bounds = array<i64: 128, 128>}, {transform_indices = @transform_8, window_bounds = array<i64: 8, 128>}]} {
    %c0_i32 = arith.constant 0 : i32
    %0 = arith.cmpi eq, %arg1, %c0_i32 : i32
    %1 = arith.extui %0 : i1 to i32
    %c0_i32_0 = arith.constant 0 : i32
    %2 = arith.cmpi ne, %1, %c0_i32_0 : i32
    scf.if %2 {
      %cst_36 = arith.constant 0.000000e+00 : f32
      %80 = vector.broadcast %cst_36 : f32 to vector<8x128xf32>
      %c0_37 = arith.constant 0 : index
      %c0_38 = arith.constant 0 : index
      %81 = vector.load %arg11[%c0_37, %c0_38] : memref<8x128xf32, #tpu.memory_space<vmem>>, vector<8x128xf32>
      tpu.vector_store %arg11[%c0_37, %c0_38], %80 {strides = array<i32>} : memref<8x128xf32, #tpu.memory_space<vmem>>, vector<8x128xf32>,
    } else {
    }
    %c1_i32 = arith.constant 1 : i32
    %3 = arith.muli %arg0, %c1_i32 : i32
    %4 = arith.addi %3, %arg1 : i32
    %c16_i32 = arith.constant 16 : i32
    %5 = arith.muli %4, %c16_i32 : i32
    %6 = tpu.iota {dimensions = array<i32: 0>} : vector<16x1xi32>
    %7 = vector.broadcast %5 : i32 to vector<16x1xi32>
    %8 = arith.addi %7, %6 : vector<16x1xi32>
    %c16_i32_1 = arith.constant 16 : i32
    %9 = vector.broadcast %c16_i32_1 : i32 to vector<16x1xi32>
    %10 = arith.cmpi slt, %8, %9 : vector<16x1xi32>
    %c0 = arith.constant 0 : index
    %c0_2 = arith.constant 0 : index
    %11 = vector.load %arg2[%c0, %c0_2] : memref<16x32xf32, #tpu.memory_space<vmem>>, vector<16x32xf32>
    %cst = arith.constant 0.000000e+00 : f32
    %12 = vector.shape_cast %10 : vector<16x1xi1> to vector<16x1xi1>
    %13 = vector.broadcast %12 : vector<16x1xi1> to vector<16x32xi1>
    %14 = vector.broadcast %cst : f32 to vector<16x32xf32>
    %15 = arith.select %13, %11, %14 : vector<16x32xi1>, vector<16x32xf32>
    %16 = arith.truncf %15 : vector<16x32xf32> to vector<16x32xbf16>
    %c0_3 = arith.constant 0 : index
    %c0_4 = arith.constant 0 : index
    %17 = vector.load %arg3[%c0_3, %c0_4] : memref<32x128xbf16, #tpu.memory_space<vmem>>, vector<32x128xbf16>
    %cst_5 = arith.constant dense<0.000000e+00> : vector<16x128xf32>
    %18 = tpu.matmul %16, %17, %cst_5 {dimension_numbers = #tpu.dot_dimension_numbers<[1], [0], [0], [1], [0, 0, 1, 1], [], []>} : vector<16x32xbf16>, vector<32x128xbf16>, vector<16x128xf32> -> vector<16x128xf32>
    %c0_6 = arith.constant 0 : index
    %c0_7 = arith.constant 0 : index
    %19 = vector.load %arg4[%c0_6, %c0_7] : memref<1x128xf32, #tpu.memory_space<vmem>>, vector<1x128xf32>
    %20 = vector.broadcast %19 : vector<1x128xf32> to vector<16x128xf32>
    %21 = arith.addf %18, %20 : vector<16x128xf32>
    %22 = vector.extract_strided_slice %21 {offsets = [0, 32], sizes = [16, 1], strides = [1, 1]} : vector<16x128xf32> to vector<16x1xf32>
    %23 = arith.negf %22 : vector<16x1xf32>
    %24 = math.exp %23 : vector<16x1xf32>
    %cst_8 = arith.constant 1.000000e+00 : f32
    %25 = vector.broadcast %cst_8 : f32 to vector<16x1xf32>
    %26 = arith.addf %25, %24 : vector<16x1xf32>
    %27 = arith.divf %25, %26 : vector<16x1xf32>
    %cst_9 = arith.constant 0.000000e+00 : f32
    %28 = vector.broadcast %cst_9 : f32 to vector<16x1xf32>
    %29 = arith.select %10, %27, %28 : vector<16x1xi1>, vector<16x1xf32>
    %cst_10 = arith.constant 0.000000e+00 : f32
    %30 = vector.broadcast %cst_10 : f32 to vector<16x128xf32>
    %31 = arith.maximumf %21, %30 : vector<16x128xf32>
    %32 = arith.truncf %31 : vector<16x128xf32> to vector<16x128xbf16>
    %c0_11 = arith.constant 0 : index
    %c0_12 = arith.constant 0 : index
    %33 = vector.load %arg5[%c0_11, %c0_12] : memref<128x128xbf16, #tpu.memory_space<vmem>>, vector<128x128xbf16>
    %cst_13 = arith.constant dense<0.000000e+00> : vector<16x128xf32>
    %34 = tpu.matmul %32, %33, %cst_13 {dimension_numbers = #tpu.dot_dimension_numbers<[1], [0], [0], [1], [0, 0, 1, 1], [], []>} : vector<16x128xbf16>, vector<128x128xbf16>, vector<16x128xf32> -> vector<16x128xf32>
    %c0_14 = arith.constant 0 : index
    %c0_15 = arith.constant 0 : index
    %35 = vector.load %arg6[%c0_14, %c0_15] : memref<1x128xf32, #tpu.memory_space<vmem>>, vector<1x128xf32>
    %36 = vector.broadcast %35 : vector<1x128xf32> to vector<16x128xf32>
    %37 = arith.addf %34, %36 : vector<16x128xf32>
    %cst_16 = arith.constant 0.000000e+00 : f32
    %38 = vector.broadcast %cst_16 : f32 to vector<16x128xf32>
    %39 = arith.maximumf %37, %38 : vector<16x128xf32>
    %40 = arith.truncf %39 : vector<16x128xf32> to vector<16x128xbf16>
    %c0_17 = arith.constant 0 : index
    %c0_18 = arith.constant 0 : index
    %41 = vector.load %arg7[%c0_17, %c0_18] : memref<128x128xbf16, #tpu.memory_space<vmem>>, vector<128x128xbf16>
    %cst_19 = arith.constant dense<0.000000e+00> : vector<16x128xf32>
    %42 = tpu.matmul %40, %41, %cst_19 {dimension_numbers = #tpu.dot_dimension_numbers<[1], [0], [0], [1], [0, 0, 1, 1], [], []>} : vector<16x128xbf16>, vector<128x128xbf16>, vector<16x128xf32> -> vector<16x128xf32>
    %c0_20 = arith.constant 0 : index
    %c0_21 = arith.constant 0 : index
    %43 = vector.load %arg8[%c0_20, %c0_21] : memref<1x128xf32, #tpu.memory_space<vmem>>, vector<1x128xf32>
    %44 = vector.broadcast %43 : vector<1x128xf32> to vector<16x128xf32>
    %45 = arith.addf %42, %44 : vector<16x128xf32>
    %cst_22 = arith.constant 0.000000e+00 : f32
    %46 = vector.broadcast %cst_22 : f32 to vector<16x128xf32>
    %47 = arith.maximumf %45, %46 : vector<16x128xf32>
    %48 = arith.truncf %47 : vector<16x128xf32> to vector<16x128xbf16>
    %49 = tpu.iota {dimensions = array<i32: 1>} : vector<16x8xi32>
    %c8_i32 = arith.constant 8 : i32
    %c0_i32_23 = arith.constant 0 : i32
    %50 = arith.cmpi eq, %c8_i32, %c0_i32_23 : i32
    %c1_i32_24 = arith.constant 1 : i32
    %51 = arith.select %50, %c1_i32_24, %c8_i32 : i32
    %52 = vector.broadcast %51 : i32 to vector<16x1xi32>
    %53 = arith.remsi %8, %52 : vector<16x1xi32>
    %c0_i32_25 = arith.constant 0 : i32
    %54 = vector.broadcast %c0_i32_25 : i32 to vector<16x1xi32>
    %55 = arith.cmpi ne, %53, %54 : vector<16x1xi32>
    %c0_i32_26 = arith.constant 0 : i32
    %56 = vector.broadcast %c0_i32_26 : i32 to vector<16x1xi32>
    %57 = arith.cmpi slt, %53, %56 : vector<16x1xi32>
    %c0_i32_27 = arith.constant 0 : i32
    %58 = arith.cmpi slt, %51, %c0_i32_27 : i32
    %59 = vector.broadcast %58 : i1 to vector<16x1xi1>
    %60 = vector.broadcast %59 : vector<16x1xi1> to vector<16x1xi1>
    %61 = arith.xori %57, %60 : vector<16x1xi1>
    %62 = arith.andi %61, %55 : vector<16x1xi1>
    %63 = vector.broadcast %51 : i32 to vector<16x1xi32>
    %64 = arith.addi %53, %63 : vector<16x1xi32>
    %65 = arith.select %62, %64, %53 : vector<16x1xi1>, vector<16x1xi32>
    %66 = vector.broadcast %65 : vector<16x1xi32> to vector<16x8xi32>
    %67 = arith.cmpi eq, %66, %49 : vector<16x8xi32>
    %cst_28 = arith.constant 0.000000e+00 : f32
    %68 = vector.shape_cast %29 : vector<16x1xf32> to vector<16x1xf32>
    %69 = vector.broadcast %68 : vector<16x1xf32> to vector<16x8xf32>
    %70 = vector.broadcast %cst_28 : f32 to vector<16x8xf32>
    %71 = arith.select %67, %69, %70 : vector<16x8xi1>, vector<16x8xf32>
    %72 = arith.truncf %71 : vector<16x8xf32> to vector<16x8xbf16>
    %c0_29 = arith.constant 0 : index
    %c0_30 = arith.constant 0 : index
    %73 = vector.load %arg11[%c0_29, %c0_30] : memref<8x128xf32, #tpu.memory_space<vmem>>, vector<8x128xf32>
    %cst_31 = arith.constant dense<0.000000e+00> : vector<8x128xf32>
    %74 = tpu.matmul %72, %48, %cst_31 {dimension_numbers = #tpu.dot_dimension_numbers<[0], [0], [1], [1], [0, 1, 1, 1], [], []>} : vector<16x8xbf16>, vector<16x128xbf16>, vector<8x128xf32> -> vector<8x128xf32>
    %75 = arith.addf %73, %74 : vector<8x128xf32>
    %c0_32 = arith.constant 0 : index
    %c0_33 = arith.constant 0 : index
    %76 = vector.load %arg11[%c0_32, %c0_33] : memref<8x128xf32, #tpu.memory_space<vmem>>, vector<8x128xf32>
    tpu.vector_store %arg11[%c0_32, %c0_33], %75 {strides = array<i32>} : memref<8x128xf32, #tpu.memory_space<vmem>>, vector<8x128xf32>,
    %c0_i32_34 = arith.constant 0 : i32
    %77 = arith.cmpi eq, %arg1, %c0_i32_34 : i32
    %78 = arith.extui %77 : i1 to i32
    %c0_i32_35 = arith.constant 0 : i32
    %79 = arith.cmpi ne, %78, %c0_i32_35 : i32
    scf.if %79 {
      %c0_36 = arith.constant 0 : index
      %c0_37 = arith.constant 0 : index
      %80 = vector.load %arg11[%c0_36, %c0_37] : memref<8x128xf32, #tpu.memory_space<vmem>>, vector<8x128xf32>
      %81 = arith.truncf %80 : vector<8x128xf32> to vector<8x128xbf16>
      %c0_38 = arith.constant 0 : index
      %c0_39 = arith.constant 0 : index
      %82 = vector.load %arg9[%c0_38, %c0_39] : memref<128x128xbf16, #tpu.memory_space<vmem>>, vector<128x128xbf16>
      %cst_40 = arith.constant dense<0.000000e+00> : vector<8x128xf32>
      %83 = tpu.matmul %81, %82, %cst_40 {dimension_numbers = #tpu.dot_dimension_numbers<[1], [0], [0], [1], [0, 0, 1, 1], [], []>} : vector<8x128xbf16>, vector<128x128xbf16>, vector<8x128xf32> -> vector<8x128xf32>
      %c0_41 = arith.constant 0 : index
      %c0_42 = arith.constant 0 : index
      %84 = vector.load %arg10[%c0_41, %c0_42] : memref<8x128xf32, #tpu.memory_space<vmem>>, vector<8x128xf32>
      tpu.vector_store %arg10[%c0_41, %c0_42], %83 {strides = array<i32>} : memref<8x128xf32, #tpu.memory_space<vmem>>, vector<8x128xf32>,
    } else {
    }
    return
  }
  func.func @transform_0(%arg0: i32, %arg1: i32) -> (i32, i32) {
    %c1_i32 = arith.constant 1 : i32
    %0 = arith.muli %arg0, %c1_i32 : i32
    %1 = arith.addi %0, %arg1 : i32
    %c0_i32 = arith.constant 0 : i32
    %c0_i32_0 = arith.constant 0 : i32
    return %1, %c0_i32 : i32, i32
  }
  func.func @transform_1(%arg0: i32, %arg1: i32) -> (i32, i32) {
    %c0_i32 = arith.constant 0 : i32
    %c0_i32_0 = arith.constant 0 : i32
    %c0_i32_1 = arith.constant 0 : i32
    return %c0_i32, %c0_i32_0 : i32, i32
  }
  func.func @transform_2(%arg0: i32, %arg1: i32) -> (i32, i32) {
    %c0_i32 = arith.constant 0 : i32
    %c0_i32_0 = arith.constant 0 : i32
    %c0_i32_1 = arith.constant 0 : i32
    return %c0_i32, %c0_i32_0 : i32, i32
  }
  func.func @transform_3(%arg0: i32, %arg1: i32) -> (i32, i32) {
    %c0_i32 = arith.constant 0 : i32
    %c0_i32_0 = arith.constant 0 : i32
    %c0_i32_1 = arith.constant 0 : i32
    return %c0_i32, %c0_i32_0 : i32, i32
  }
  func.func @transform_4(%arg0: i32, %arg1: i32) -> (i32, i32) {
    %c0_i32 = arith.constant 0 : i32
    %c0_i32_0 = arith.constant 0 : i32
    %c0_i32_1 = arith.constant 0 : i32
    return %c0_i32, %c0_i32_0 : i32, i32
  }
  func.func @transform_5(%arg0: i32, %arg1: i32) -> (i32, i32) {
    %c0_i32 = arith.constant 0 : i32
    %c0_i32_0 = arith.constant 0 : i32
    %c0_i32_1 = arith.constant 0 : i32
    return %c0_i32, %c0_i32_0 : i32, i32
  }
  func.func @transform_6(%arg0: i32, %arg1: i32) -> (i32, i32) {
    %c0_i32 = arith.constant 0 : i32
    %c0_i32_0 = arith.constant 0 : i32
    %c0_i32_1 = arith.constant 0 : i32
    return %c0_i32, %c0_i32_0 : i32, i32
  }
  func.func @transform_7(%arg0: i32, %arg1: i32) -> (i32, i32) {
    %c0_i32 = arith.constant 0 : i32
    %c0_i32_0 = arith.constant 0 : i32
    %c0_i32_1 = arith.constant 0 : i32
    return %c0_i32, %c0_i32_0 : i32, i32
  }
  func.func @transform_8(%arg0: i32, %arg1: i32) -> (i32, i32) {
    %c0_i32 = arith.constant 0 : i32
    %c0_i32_0 = arith.constant 0 : i32
    return %arg0, %c0_i32 : i32, i32
  }
}

</mosaic_0001>

<bundles_post_ra>
// kernel: graph_embed.1
= control target key start
LH: loop header
LB: loop body
LE: loop exit
PB: predicated region body
PF: predicated region fallthrough
CT: control target
= control target key end

     0   :  { %v798_v0 = vmov 0.0   ;;  %vm799_vm0 = vmmov 0   ;;  %vm99_vm1 = vcmask 261120   ;;  %v800_v14 = vmov 32   ;;  %s979_s1 = inlined_call_operand.vmem [shape: bf16[32,128], index: 1, kind: input, shape index: {}]   ;;  %s980_s0 = inlined_call_operand.vmem [shape: f32[16,32], index: 0, kind: input, shape index: {}]   ;;  %s981_s3 = inlined_call_operand.vmem [shape: bf16[128,128], index: 3, kind: input, shape index: {}]   ;;  %s982_s2 = inlined_call_operand.vmem [shape: f32[1,128], index: 2, kind: input, shape index: {}]   ;;  %s983_s5 = inlined_call_operand.vmem [shape: bf16[128,128], index: 5, kind: input, shape index: {}]   ;;  %s984_s4 = inlined_call_operand.vmem [shape: f32[1,128], index: 4, kind: input, shape index: {}]   ;;  %s985_s7 = inlined_call_operand.vmem [shape: bf16[128,128], index: 7, kind: input, shape index: {}]   ;;  %s986_s6 = inlined_call_operand.vmem [shape: f32[1,128], index: 6, kind: input, shape index: {}]   ;;  %s987_s8 = inlined_call_operand.vmem [shape: f32[8,128], index: 8, kind: output, shape index: {}]  }
   0x1   :  { %680 = vmatprep.subr.bf16.mxu1 %v798_v0  ;;  %v764_v1 = vld [vmem:[%s979_s1] sm:$0xff]   ;;  %684 = vmatprep.mubr.msk.bf16.mxu1 %vm799_vm0, %v798_v0  ;;  %v765_v2 = vld [vmem:[%s979_s1 + $0x8] sm:$0xff]   ;;  %v768_v8 = vld [vmem:[%s981_s3 + $0x10] sm:$0xff]   ;;  %v59_v42 = vlaneseq  ;;  %vm449_vm4 = vcmask 130048  }
   0x2   :  { %708 = vmatprep.subr.bf16.mxu0 %v798_v0  ;;  %724 = vmatprep.mubr.msk.bf16.mxu0 %vm799_vm0, %v798_v0  ;;  %v67_v3 = vld [vmem:[%s980_s0] sm:$0xff]  ;;  %v68_v4 = vld [vmem:[%s980_s0 + $0x8] sm:$0xff]  ;;  %v769_v9 = vld [vmem:[%s981_s3 + $0x18] sm:$0xff]  }
   0x3   :  { %681 = vmatpush3.bf16.msra.mxu1 %v764_v1  ;;  %v75_v5 = vpack.c.bf16 %v68_v4, %v67_v3  ;;  %v766_v6 = vld [vmem:[%s981_s3] sm:$0xff]   ;;  %v767_v7 = vld [vmem:[%s981_s3 + $0x8] sm:$0xff]   ;;  %v772_v12 = vld [vmem:[%s981_s3 + $0x30] sm:$0xff]   ;;  %758 = vset.pattern.permute.xlu0 %v800_v14  ;;  %v60_v43 = vshrl.u32 %v59_v42, 7  ;;  %v392_v45 = vand.u32 127, %v59_v42 }
   0x4   :  { %682 = vmatprep.subr.bf16.mxu1 %v798_v0  ;;  %v770_v10 = vld [vmem:[%s981_s3 + $0x20] sm:$0xff]   ;;  %v771_v11 = vld [vmem:[%s981_s3 + $0x28] sm:$0xff]   ;;  %v773_v13 = vld [vmem:[%s981_s3 + $0x38] sm:$0xff]  }
   0x5   :  { %v615_v15 = vld [vmem:[%s982_s2] ss:$0 sm:$0xff]  ;;  %v775_v35 = vld [vmem:[%s983_s5 + $0x8] sm:$0xff]   ;;  %v776_v36 = vld [vmem:[%s983_s5 + $0x10] sm:$0xff]   ;;  %v61_v44 = vadd.s32 8, %v60_v43  ;;  %v397_v46 = vand.u32 7, %v60_v43 }
   0x6   :  { %v774_v34 = vld [vmem:[%s983_s5] sm:$0xff]   ;;  %v777_v37 = vld [vmem:[%s983_s5 + $0x18] sm:$0xff]   ;;  %v779_v39 = vld [vmem:[%s983_s5 + $0x28] sm:$0xff]  }
   0x7   :  { %683 = vmatpush3.bf16.msra.mxu1 %v765_v2  ;;  %709 = vmatpush3.bf16.msra.mxu0 %v774_v34  ;;  %v778_v38 = vld [vmem:[%s983_s5 + $0x20] sm:$0xff]   ;;  %v780_v40 = vld [vmem:[%s983_s5 + $0x30] sm:$0xff]   ;;  %v781_v41 = vld [vmem:[%s983_s5 + $0x38] sm:$0xff]   ;;  %v404_v47 = vand.u32 7, %v61_v44  ;;  %vm417_vm2 = vcmp.eq.s32.totalorder %v397_v46, %v392_v45 }
   0x8   :  { %688 = vmatprep.subr.bf16.mxu1 %v798_v0  ;;  %710 = vmatprep.subr.bf16.mxu0 %v798_v0  ;;  %v621_v54 = vld [vmem:[%s984_s4] ss:$0 sm:$0xff]  ;;  %v783_v2 = vld [vmem:[%s985_s7 + $0x8] sm:$0xff]   ;;  %v784_v3 = vld [vmem:[%s985_s7 + $0x10] sm:$0xff]  }
   0x9   :  { %vm418_vm3 = vcmp.eq.s32.totalorder %v404_v47, %v392_v45  ;;  %v782_v1 = vld [vmem:[%s985_s7] sm:$0xff]   ;;  %v785_v4 = vld [vmem:[%s985_s7 + $0x18] sm:$0xff]  }
   0xa   :  { %685 = vmatmul.mubr.msk.bf16.vlgmr.msra.gmra.mrb[0].mxu1 %vm99_vm1, %v75_v5  ;;  %v786_v5 = vld [vmem:[%s985_s7 + $0x20] sm:$0xff]  }
   0xb   :  { %689 = vmatpush3.bf16.msra.mxu1 %v766_v6  ;;  %704 = vmatprep.mubr.msk.bf16.mxu1 %vm799_vm0, %v798_v0  ;;  %v787_v6 = vld [vmem:[%s985_s7 + $0x28] sm:$0xff]  }
   0xc   :  { %690 = vmatprep.subr.bf16.mxu1 %v798_v0  ;;  %711 = vmatpush3.bf16.msra.mxu0 %v775_v35 }
   0xd   :  { %712 = vmatprep.subr.bf16.mxu0 %v798_v0 }
   0xf   :  { %691 = vmatpush3.bf16.msra.mxu1 %v767_v7  ;;  %v788_v7 = vld [vmem:[%s985_s7 + $0x30] sm:$0xff]  }
  0x10   :  { %692 = vmatprep.subr.bf16.mxu1 %v798_v0  ;;  %713 = vmatpush3.bf16.msra.mxu0 %v776_v36 }
  0x11   :  { %714 = vmatprep.subr.bf16.mxu0 %v798_v0 }
  0x13   :  { %693 = vmatpush3.bf16.msra.mxu1 %v768_v8  ;;  %v630_v8 = vld [vmem:[%s986_s6] ss:$0 sm:$0xff] }
  0x14   :  { %694 = vmatprep.subr.bf16.mxu1 %v798_v0  ;;  %715 = vmatpush3.bf16.msra.mxu0 %v777_v37 }
  0x15   :  { %716 = vmatprep.subr.bf16.mxu0 %v798_v0 }
  0x17   :  { %695 = vmatpush3.bf16.msra.mxu1 %v769_v9 }
  0x18   :  { %696 = vmatprep.subr.bf16.mxu1 %v798_v0  ;;  %717 = vmatpush3.bf16.msra.mxu0 %v778_v38 }
  0x19   :  { %718 = vmatprep.subr.bf16.mxu0 %v798_v0 }
  0x1b   :  { %697 = vmatpush3.bf16.msra.mxu1 %v770_v10 }
  0x1c   :  { %698 = vmatprep.subr.bf16.mxu1 %v798_v0  ;;  %719 = vmatpush3.bf16.msra.mxu0 %v779_v39 }
  0x1d   :  { %720 = vmatprep.subr.bf16.mxu0 %v798_v0 }
  0x1f   :  { %699 = vmatpush3.bf16.msra.mxu1 %v771_v11 }
  0x20   :  { %700 = vmatprep.subr.bf16.mxu1 %v798_v0  ;;  %721 = vmatpush3.bf16.msra.mxu0 %v780_v40 }
  0x21   :  { %722 = vmatprep.subr.bf16.mxu0 %v798_v0 }
  0x23   :  { %701 = vmatpush3.bf16.msra.mxu1 %v772_v12 }
  0x24   :  { %702 = vmatprep.subr.bf16.mxu1 %v798_v0  ;;  %723 = vmatpush3.bf16.msra.mxu0 %v781_v41 }
  0x25   :  { %734 = vmatprep.subr.bf16.mxu0 %v798_v0 }
  0x27   :  { %703 = vmatpush3.bf16.msra.mxu1 %v773_v13 }
  0x28   :  { %728 = vmatprep.subr.bf16.mxu1 %v798_v0 }
  0xdd   :  { %v137_v16 = vpop.f32.mrb[0].mxu1 }
  0xde   :  { %v138_v17 = vadd.f32 %v615_v15, %v137_v16  ;;  %v686_v18 = vpop.f32.mrb[1].mxu1 }
  0xdf   :  { %v140_v19 = vpop.f32.mrb[2].mxu1 }
  0xe0   :  { %v619_v20 = vmul.f32 -1.442695, %v138_v17  ;;  %v141_v21 = vadd.f32 %v615_v15, %v140_v19  ;;  %v687_v22 = vpop.f32.mrb[3].mxu1  ;;  %v158_v23 = vmax.f32 %v138_v17, 0.0 }
  0xe2   :  { %790 = vpow2.f32 %v619_v20  ;;  %v620_v24 = vmul.f32 -1.442695, %v141_v21  ;;  %v159_v25 = vmax.f32 %v141_v21, 0.0 }
  0xe4   :  { %792 = vpow2.f32 %v620_v24  ;;  %v160_v26 = vpack.c.bf16 %v159_v25, %v158_v23 }
  0xe6   :  { %705 = vmatmul.mubr.bf16.vlgmr.msra.gmra.mrb[4].mxu1 %v160_v26 }
  0xe7   :  { %730 = vmatprep.mubr.msk.bf16.mxu1 %vm799_vm0, %v798_v0 }
  0xec   :  { %v791_v27 = vpop.eup %790 }
  0xed   :  { %v150_v28 = vadd.f32 1.0, %v791_v27 }
  0xee   :  { %v793_v29 = vpop.eup %792 }
  0xef   :  { %v151_v30 = vadd.f32 1.0, %v793_v29  ;;  %794 = vrcp.f32 %v150_v28 }
  0xf1   :  { %796 = vrcp.f32 %v151_v30 }
  0xf9   :  { %v795_v31 = vpop.eup %794 }
  0xfb   :  { %v797_v32 = vpop.eup %796 }
  0xfc   :  { %v759_v33 = vpack.i.bf16 %v797_v32, %v795_v31 }
  0xfe   :  { %760 = vperm.xlu0 %758, %v759_v33  }
 0x17d   :  { %v761_v48 = vpop.permute.xlu0 %760 }
 0x17e   :  { %v763_v49 = vunpack.i.h.bf16 %v761_v48  ;;  %v762_v50 = vunpack.i.l.bf16 %v761_v48 }
 0x180   :  { %v430_v51 = vsel %vm418_vm3, %v763_v49, 0.0  ;;  %v429_v52 = vsel %vm417_vm2, %v762_v50, 0.0 }
 0x181   :  { %v431_v53 = vpack.c.bf16 %v430_v51, %v429_v52 }
 0x183   :  { %433 = vxpose.xlu0.c.b16.start.end [1/1] (short) (narrow) %v431_v53, 16 }
 0x1b9   :  { %v266_v55 = vpop.f32.mrb[4].mxu1 }
 0x1ba   :  { %v267_v56 = vadd.f32 %v621_v54, %v266_v55  ;;  %v706_v57 = vpop.f32.mrb[5].mxu1 }
 0x1bb   :  { %v269_v58 = vpop.f32.mrb[6].mxu1 }
 0x1bc   :  { %v270_v59 = vadd.f32 %v621_v54, %v269_v58  ;;  %v707_v60 = vpop.f32.mrb[7].mxu1  ;;  %v273_v61 = vmax.f32 %v267_v56, 0.0 }
 0x1be   :  { %v274_v62 = vmax.f32 %v270_v59, 0.0 }
 0x1c0   :  { %v275_v63 = vpack.c.bf16 %v274_v62, %v273_v61 }
 0x1c2   :  { %725 = vmatmul.mubr.bf16.vlgmr.msra.gmra.mrb[0].mxu0 %v275_v63 }
 0x1c3   :  { %750 = vmatprep.mubr.msk.bf16.mxu0 %vm799_vm0, %v798_v0  ;;  %735 = vmatpush3.bf16.msra.mxu0 %v782_v1 }
 0x1c4   :  { %736 = vmatprep.subr.bf16.mxu0 %v798_v0 }
 0x1c7   :  { %737 = vmatpush3.bf16.msra.mxu0 %v783_v2 }
 0x1c8   :  { %738 = vmatprep.subr.bf16.mxu0 %v798_v0 }
 0x1cb   :  { %739 = vmatpush3.bf16.msra.mxu0 %v784_v3 }
 0x1cc   :  { %740 = vmatprep.subr.bf16.mxu0 %v798_v0 }
 0x1cf   :  { %741 = vmatpush3.bf16.msra.mxu0 %v785_v4 }
 0x1d0   :  { %742 = vmatprep.subr.bf16.mxu0 %v798_v0 }
 0x1d3   :  { %743 = vmatpush3.bf16.msra.mxu0 %v786_v5 }
 0x1d4   :  { %744 = vmatprep.subr.bf16.mxu0 %v798_v0 }
 0x1d7   :  { %745 = vmatpush3.bf16.msra.mxu0 %v787_v6 }
 0x1d8   :  { %746 = vmatprep.subr.bf16.mxu0 %v798_v0 }
 0x1db   :  { %747 = vmatpush3.bf16.msra.mxu0 %v788_v7 }
 0x1dc   :  { %748 = vmatprep.subr.bf16.mxu0 %v798_v0  ;;  %v789_v0 = vld [vmem:[%s985_s7 + $0x38] sm:$0xff]  }
 0x1df   :  { %749 = vmatpush3.bf16.msra.mxu0 %v789_v0 }
 0x1e9   :  { %v441_v18 = vpop.trf.xlu0 }
 0x295   :  { %v381_v9 = vpop.f32.mrb[0].mxu0 }
 0x296   :  { %v382_v10 = vadd.f32 %v630_v8, %v381_v9  ;;  %v726_v11 = vpop.f32.mrb[1].mxu0 }
 0x297   :  { %v384_v12 = vpop.f32.mrb[2].mxu0 }
 0x298   :  { %v385_v13 = vadd.f32 %v630_v8, %v384_v12  ;;  %v727_v14 = vpop.f32.mrb[3].mxu0  ;;  %v388_v15 = vmax.f32 %v382_v10, 0.0 }
 0x29a   :  { %v389_v16 = vmax.f32 %v385_v13, 0.0 }
 0x29c   :  { %v390_v17 = vpack.c.bf16 %v389_v16, %v388_v15 }
 0x29e   :  { %729 = vmatpush3.bf16.msra.mxu1 %v390_v17 }
 0x2a1   :  { %731 = vmatmul.mubr.msk.bf16.vlgmr.msra.gmra.mrb[8].mxu1 %vm449_vm4, %v441_v18 }
 0x374   :  { %v487_v19 = vpop.f32.mrb[8].mxu1 }
 0x375   :  { %v499_v20 = vpack.c.bf16 %v487_v19, %v487_v19  ;;  %v732_v21 = vpop.f32.mrb[9].mxu1 }
 0x376   :  { %v490_v22 = vpop.f32.mrb[10].mxu1 }
 0x377   :  { %v733_v23 = vpop.f32.mrb[11].mxu1  ;;  %751 = vmatmul.mubr.bf16.vlgmr.msra.gmra.mrb[4].mxu0 %v499_v20 }
 0x44a   :  { %v598_v24 = vpop.f32.mrb[4].mxu0 }
 0x44b   :  { %604 = vst [vmem:[%s987_s8] sm:$0xff] %v598_v24  ;;  %v752_v25 = vpop.f32.mrb[5].mxu0 }
 0x44c   :  { %v601_v26 = vpop.f32.mrb[6].mxu0 }
 0x44d   :  { %v753_v27 = vpop.f32.mrb[7].mxu0 }

</bundles_post_ra>
